<compile_context>
chip_gen: v7x
topology: tpu7x:2x2x1
jax: 0.10.0
libtpu: 0.0.40
codegen_flags: <defaults>
</compile_context>

<pallas_src>
import jax
import jax.numpy as jnp
from jax.experimental import pallas as pl
from jax.experimental.pallas import tpu as pltpu


def _round_up(x, m):
    return ((x + m - 1) // m) * m


def siamese_kernel(x1_ref, x2_ref, w1_ref, w2_ref, b_ref, o_ref):
    # x1/x2: (TM, F) activation tiles; w1/w2: (1, F) weight halves (resident,
    # constant index_map => fetched once); b: (1, 1) scalar in SMEM.
    x1 = x1_ref[...]                     # (TM, F)
    x2 = x2_ref[...]                     # (TM, F)
    w1 = w1_ref[...]                     # (1, F) -> broadcasts over batch rows
    w2 = w2_ref[...]                     # (1, F)

    # VPU elementwise multiply-add, then a single lane reduce (XLU).
    s = x1 * w1 + x2 * w2                # (TM, F)
    y = jnp.sum(s, axis=-1, keepdims=True)  # (TM, 1), f32 accumulation
    o_ref[...] = (y + b_ref[0, 0]).astype(o_ref.dtype)


def siamese_forward(input1, input2, weight, bias,
                    *, vmem_budget_bytes=16 * 1024 * 1024,
                    max_block_rows=32768):
    """output = Linear(concat(input1, input2, dim=1)) with fc weight (1, 2F)."""
    B, F = input1.shape
    assert input2.shape == (B, F)
    assert weight.shape == (1, 2 * F)

    # Split the Linear weight in the wrapper (free layout plumbing) so the
    # kernel never concatenates.
    w1 = weight[:, :F].astype(jnp.float32)          # (1, F)
    w2 = weight[:, F:].astype(jnp.float32)          # (1, F)
    bias2d = jnp.asarray(bias, jnp.float32).reshape(1, 1)

    # Batch tile: 2 inputs x 2 pipeline buffers must fit the VMEM budget.
    itemsize = jnp.dtype(input1.dtype).itemsize
    per_row_bytes = 2 * 2 * F * itemsize
    tm = vmem_budget_bytes // per_row_bytes
    tm = max(8, min(max_block_rows, (tm // 8) * 8))  # multiple of 8 sublanes
    tm = min(tm, _round_up(B, 8))                    # don't over-tile tiny B

    bp = _round_up(B, tm)
    grid = bp // tm
    if bp != B:
        pad = bp - B
        input1 = jnp.pad(input1, ((0, pad), (0, 0)))
        input2 = jnp.pad(input2, ((0, pad), (0, 0)))

    out = pl.pallas_call(
        siamese_kernel,
        out_shape=jax.ShapeDtypeStruct((bp, 1), jnp.float32),
        grid=(grid,),
        in_specs=[
            pl.BlockSpec((tm, F), lambda i: (i, 0)),     # input1 tile
            pl.BlockSpec((tm, F), lambda i: (i, 0)),     # input2 tile
            pl.BlockSpec((1, F), lambda i: (0, 0)),      # w1 (resident)
            pl.BlockSpec((1, F), lambda i: (0, 0)),      # w2 (resident)
            pl.BlockSpec(memory_space=pltpu.MemorySpace.SMEM),  # bias scalar
        ],
        out_specs=pl.BlockSpec((tm, 1), lambda i: (i, 0)),
        compiler_params=pltpu.CompilerParams(
            dimension_semantics=("parallel",),           # shard batch tiles
        ),
    )(input1, input2, w1, w2, bias2d)

    return out[:B]


if __name__ == "__main__":
    # Small, forward-consistent shapes: batch=8, resnet feature dim=32.
    B = 8
    NUM_FTRS = 32

    key = jax.random.PRNGKey(0)
    k1, k2, kw, kb = jax.random.split(key, 4)

    input1 = jax.random.normal(k1, (B, NUM_FTRS), dtype=jnp.float32)
    input2 = jax.random.normal(k2, (B, NUM_FTRS), dtype=jnp.float32)

    # nn.Linear(2F, 1) default init: uniform in [-1/sqrt(fan_in), 1/sqrt(fan_in)].
    fan_in = 2 * NUM_FTRS
    bound = 1.0 / jnp.sqrt(jnp.float32(fan_in))
    weight = jax.random.uniform(kw, (1, fan_in), minval=-bound, maxval=bound,
                                dtype=jnp.float32)
    bias = jax.random.uniform(kb, (1,), minval=-bound, maxval=bound,
                              dtype=jnp.float32)

    out = siamese_forward(input1, input2, weight, bias)
    out = jax.block_until_ready(out)

    # Pure-JAX reference (same semantics as the PyTorch forward).
    ref = jnp.concatenate([input1, input2], axis=1) @ weight.T + bias[None, :]
    assert out.shape == (B, 1)
    assert jnp.allclose(out, ref, atol=1e-5, rtol=1e-5)

    print("KERNEL_OK")
</pallas_src>

<mosaic_0001>
module attributes {stable_mosaic.version = 11 : i64} {
  func.func @siamese_kernel(%arg0: i32, %arg1: memref<8x32xf32, #tpu.memory_space<vmem>>, %arg2: memref<8x32xf32, #tpu.memory_space<vmem>>, %arg3: memref<1x32xf32, #tpu.memory_space<vmem>>, %arg4: memref<1x32xf32, #tpu.memory_space<vmem>>, %arg5: memref<1x1xf32, #tpu.memory_space<smem>>, %arg6: memref<8x1xf32, #tpu.memory_space<vmem>>) attributes {dimension_semantics = [#tpu.dimension_semantics<parallel>], iteration_bounds = array<i64: 1>, scalar_prefetch = 0 : i64, scratch_operands = 0 : i64, tpu.core_type = #tpu.core_type<tc>, window_params = [{transform_indices = @transform_0, window_bounds = array<i64: 8, 32>}, {transform_indices = @transform_1, window_bounds = array<i64: 8, 32>}, {pipeline_mode = #tpu.pipeline_mode<synchronous>, transform_indices = @transform_2, window_bounds = array<i64: 1, 32>}, {pipeline_mode = #tpu.pipeline_mode<synchronous>, transform_indices = @transform_3, window_bounds = array<i64: 1, 32>}, {transform_indices = @transform_4, window_bounds = array<i64: 1, 1>}, {transform_indices = @transform_5, window_bounds = array<i64: 8, 1>}]} {
    %c0 = arith.constant 0 : index
    %c0_0 = arith.constant 0 : index
    %0 = vector.load %arg1[%c0, %c0_0] : memref<8x32xf32, #tpu.memory_space<vmem>>, vector<8x32xf32>
    %c0_1 = arith.constant 0 : index
    %c0_2 = arith.constant 0 : index
    %1 = vector.load %arg2[%c0_1, %c0_2] : memref<8x32xf32, #tpu.memory_space<vmem>>, vector<8x32xf32>
    %c0_3 = arith.constant 0 : index
    %c0_4 = arith.constant 0 : index
    %2 = vector.load %arg3[%c0_3, %c0_4] : memref<1x32xf32, #tpu.memory_space<vmem>>, vector<1x32xf32>
    %c0_5 = arith.constant 0 : index
    %c0_6 = arith.constant 0 : index
    %3 = vector.load %arg4[%c0_5, %c0_6] : memref<1x32xf32, #tpu.memory_space<vmem>>, vector<1x32xf32>
    %4 = vector.broadcast %2 : vector<1x32xf32> to vector<8x32xf32>
    %5 = arith.mulf %0, %4 : vector<8x32xf32>
    %6 = vector.broadcast %3 : vector<1x32xf32> to vector<8x32xf32>
    %7 = arith.mulf %1, %6 : vector<8x32xf32>
    %8 = arith.addf %5, %7 : vector<8x32xf32>
    %cst = arith.constant dense<0.000000e+00> : vector<8xf32>
    %9 = vector.multi_reduction <add>, %8, %cst [1] : vector<8x32xf32> to vector<8xf32>
    %10 = vector.shape_cast %9 : vector<8xf32> to vector<8x1xf32>
    %c0_7 = arith.constant 0 : index
    %c0_8 = arith.constant 0 : index
    %11 = memref.load %arg5[%c0_7, %c0_8] : memref<1x1xf32, #tpu.memory_space<smem>>
    %12 = vector.broadcast %11 : f32 to vector<8x1xf32>
    %13 = arith.addf %10, %12 : vector<8x1xf32>
    %c0_9 = arith.constant 0 : index
    %c0_10 = arith.constant 0 : index
    %14 = vector.load %arg6[%c0_9, %c0_10] : memref<8x1xf32, #tpu.memory_space<vmem>>, vector<8x1xf32>
    tpu.vector_store %arg6[%c0_9, %c0_10], %13 {strides = array<i32>} : memref<8x1xf32, #tpu.memory_space<vmem>>, vector<8x1xf32>,
    return
  }
  func.func @transform_0(%arg0: i32) -> (i32, i32) {
    %c0_i32 = arith.constant 0 : i32
    %c0_i32_0 = arith.constant 0 : i32
    return %arg0, %c0_i32 : i32, i32
  }
  func.func @transform_1(%arg0: i32) -> (i32, i32) {
    %c0_i32 = arith.constant 0 : i32
    %c0_i32_0 = arith.constant 0 : i32
    return %arg0, %c0_i32 : i32, i32
  }
  func.func @transform_2(%arg0: i32) -> (i32, i32) {
    %c0_i32 = arith.constant 0 : i32
    %c0_i32_0 = arith.constant 0 : i32
    %c0_i32_1 = arith.constant 0 : i32
    return %c0_i32, %c0_i32_0 : i32, i32
  }
  func.func @transform_3(%arg0: i32) -> (i32, i32) {
    %c0_i32 = arith.constant 0 : i32
    %c0_i32_0 = arith.constant 0 : i32
    %c0_i32_1 = arith.constant 0 : i32
    return %c0_i32, %c0_i32_0 : i32, i32
  }
  func.func @transform_4(%arg0: i32) -> (i32, i32) {
    %c0_i32 = arith.constant 0 : i32
    %c0_i32_0 = arith.constant 0 : i32
    %c0_i32_1 = arith.constant 0 : i32
    return %c0_i32, %c0_i32_0 : i32, i32
  }
  func.func @transform_5(%arg0: i32) -> (i32, i32) {
    %c0_i32 = arith.constant 0 : i32
    %c0_i32_0 = arith.constant 0 : i32
    return %arg0, %c0_i32 : i32, i32
  }
}

</mosaic_0001>

<bundles_post_ra>
// kernel: tpu_custom_call.1
= control target key start
LH: loop header
LB: loop body
LE: loop exit
PB: predicated region body
PF: predicated region fallthrough
CT: control target
= control target key end

     0   :  { %11 = vsyncpa [#allocation4], 0  ;;  %s199_s0 = inlined_call_operand.hbm [shape: f32[8,32], index: 0, kind: input, shape index: {}]   ;;  %s200_s1 = inlined_call_operand.hbm [shape: f32[8,32], index: 1, kind: input, shape index: {}]   ;;  %s201_s2 = inlined_call_operand.vmem [shape: f32[1,32], index: 2, kind: input, shape index: {}]   ;;  %s202_s3 = inlined_call_operand.vmem [shape: f32[1,32], index: 3, kind: input, shape index: {}]   ;;  %s203_s4 = inlined_call_operand.<no memory space> [shape: f32[1,1], index: 4, kind: input, shape index: {}]   ;;  %s204_s5 = inlined_call_operand.vmem [shape: f32[8,1], index: 5, kind: output, shape index: {}]  }
   0x1   :  { %12 = vsyncpa [#allocation6], 0  ;;  %s131_s18 = smov [#allocation3]   ;;  %s132_s20 = smov [#allocation5]  }
   0x2   :  { %s19_s19 = sshll.u32 %s131_s18, 4  ;;  %s29_s21 = sshll.u32 %s132_s20, 4  ;;  %s20_s19 = int_to_ptr.vmem [resolvable:$true] %s19_s19  ;;  %s30_s21 = int_to_ptr.vmem [resolvable:$true] %s29_s21 }
   0x3   :  { %s83_s24 = scalar_lea.hbm %s199_s0, 128 }
   0x4   :  { %p84_p0 = scmp.ne.s32.totalorder %s199_s0, %s83_s24  ;;  %p87_p1 = scmp.lt.u32.totalorder %s83_s24, %s199_s0 }
   0x6   :  { %p89_p2 = pnand %p87_p1, %p84_p0 }
   0x8   :  { %92 = shalt.err (!%p89_p2)
}
   0x9   :  { %s93_s29 = scalar_lea.vmem %s20_s19, 128  ;;  %p98_p4 = scmp.lt.s32.totalorder %s20_s19, %s20_s19 }
   0xa   :  { %p94_p3 = scmp.ne.s32.totalorder %s20_s19, %s93_s29  ;;  %p99_p5 = scmp.lt.s32.totalorder %s93_s29, %s93_s29 }
   0xc   :  { %p100_p6 = por %p99_p5, %p98_p4 }
   0xe   :  { %p101_p7 = pnand %p100_p6, %p94_p3 }
  0x10   :  { %104 = shalt.err (!%p101_p7)
}
  0x11   :  { %22 = dma.hbm_to_vmem [thread:$0]  %s199_s0, 128, %s20_s19, [#allocation4]  }
  0x12   :  { %s105_s9 = scalar_lea.hbm %s200_s1, 128 }
  0x13   :  { %p106_p8 = scmp.ne.s32.totalorder %s200_s1, %s105_s9  ;;  %p109_p9 = scmp.lt.u32.totalorder %s105_s9, %s200_s1 }
  0x15   :  { %p111_p10 = pnand %p109_p9, %p106_p8 }
  0x17   :  { %114 = shalt.err (!%p111_p10)
}
  0x18   :  { %s115_s14 = scalar_lea.vmem %s30_s21, 128  ;;  %p120_p12 = scmp.lt.s32.totalorder %s30_s21, %s30_s21 }
  0x19   :  { %p116_p11 = scmp.ne.s32.totalorder %s30_s21, %s115_s14  ;;  %p121_p13 = scmp.lt.s32.totalorder %s115_s14, %s115_s14 }
  0x1b   :  { %p122_p0 = por %p121_p13, %p120_p12 }
  0x1d   :  { %p123_p1 = pnand %p122_p0, %p116_p11 }
  0x1f   :  { %126 = shalt.err (!%p123_p1)
}
  0x20   :  { %32 = dma.hbm_to_vmem [thread:$0]  %s200_s1, 128, %s30_s21, [#allocation6]  }
  0x21   :  { %127 = dma.done.wait [#allocation4], 128  }
  0x22   :  { %128 = vsyncadd [#allocation4], 4294967168 }
  0x23   :  { %129 = dma.done.wait [#allocation6], 128  }
  0x24   :  { %130 = vsyncadd [#allocation6], 4294967168  ;;  %v45_v0 = vld [vmem:[#allocation3] sm:$0xff]  ;;  %v46_v1 = vld [vmem:[#allocation5] sm:$0xff]  ;;  %vm64_vm0 = vcmask 261120   ;;  %v69_v8 = vstv %s203_s4  ;;  %vm71_vm1 = vcmask 7168  }
  0x25   :  { %v79_v2 = vld [vmem:[%s201_s2] ss:$0 sm:$0xff] }
  0x26   :  { %v80_v3 = vld [vmem:[%s202_s3] ss:$0 sm:$0xff]  ;;  %v55_v4 = vmul.f32 %v79_v2, %v45_v0 }
  0x27   :  { %v62_v5 = vmul.f32 %v80_v3, %v46_v1 }
  0x29   :  { %v63_v6 = vadd.f32 %v62_v5, %v55_v4 }
  0x2b   :  { %v65_v7 = vsel %vm64_vm0, %v63_v6, 0.0 }
  0x2c   :  { %66 = vadd.xlane.f32.xlu0 %v65_v7 }
  0xb9   :  { %v67_v9 = vpop.xlane.xlu0 %66 }
  0xba   :  { %v70_v10 = vadd.f32 %v69_v8, %v67_v9 }
  0xbc   :  { %72 = vst.msk [vmem:[%s204_s5] sm:$0xff] %vm71_vm1, %v70_v10 }
  0xbd   :  { %77 = vsyncpa [#allocation4], 1 }
  0xbe   :  { %78 = vsyncpa [#allocation6], 1 }

</bundles_post_ra>
